<compile_context>
chip_gen: v5e
topology: v5e:2x2
jax: 0.10.0
libtpu: 0.0.40
codegen_flags: <defaults>
</compile_context>

<pallas_src>
import jax
import jax.numpy as jnp
from jax import lax
from jax.experimental import pallas as pl
from jax.experimental.pallas import tpu as pltpu


def _fused_kernel(x_ref, w1_ref, skip_ref, w2_ref, o_ref):
    # x_ref:    [Cin,  M   ] bf16  input activations (channel-major, Cin=576, M=49)
    # w1_ref:   [Cmid, Cin ] bf16  conv2d50 weight with BN32 scale folded in
    # skip_ref: [Cmid, M   ] bf16  residual (x133)
    # w2_ref:   [Cblk, Kext] bf16  conv2d51 weight with BN33 scale folded in,
    #                              bias column at index Cmid, zero-padded to Kext
    # o_ref:    [Cblk, M   ] bf16  this grid step's slice of the output rows
    #
    # conv2d50 (+ folded BN32 scale) -- native bf16 MXU, f32 accumulate
    h = jnp.dot(w1_ref[...], x_ref[...], preferred_element_type=jnp.float32)
    # residual add (x148); BN32 shift rides in the bias column of w2_ref
    h = h + skip_ref[...].astype(jnp.float32)
    h_bf = h.astype(jnp.bfloat16)                          # [Cmid, M]

    # Append a "ones then zeros" tail so the bias column (and zero padding) of
    # w2_ref fold the combined BN shifts into the second matmul.
    m = h_bf.shape[1]
    tail_rows = w2_ref.shape[1] - h_bf.shape[0]            # Kext - Cmid (=16)
    tail = (lax.broadcasted_iota(jnp.int32, (tail_rows, m), 0) == 0
            ).astype(jnp.bfloat16)                         # row 0 = 1, rest = 0
    h_ext = jnp.concatenate([h_bf, tail], axis=0)          # [Kext, M]

    # conv2d51 (+ folded BN33 scale + combined bias) -- bf16 MXU, f32 accumulate
    y = jnp.dot(w2_ref[...], h_ext, preferred_element_type=jnp.float32)
    o_ref[...] = y.astype(o_ref.dtype)


def fold_params(w1, w2, g1, be1, rm1, rv1, g2, be2, rm2, rv2,
                eps=1e-3, k_pad=112):
    """One-time weight prep: fold both eval-mode BatchNorms into the 1x1 conv
    weights, fold the combined bias into an extra column of the second weight
    (zero-padded to k_pad for clean bf16 sublane tiling), ship everything bf16."""
    w1_2d = w1[:, :, 0, 0].astype(jnp.float32)             # [96, 576]
    w2_2d = w2[:, :, 0, 0].astype(jnp.float32)             # [576, 96]
    s1 = g1 / jnp.sqrt(rv1 + eps)
    b1 = be1 - rm1 * s1
    s2 = g2 / jnp.sqrt(rv2 + eps)
    b2 = be2 - rm2 * s2
    w1p = (s1[:, None] * w1_2d).astype(jnp.bfloat16)       # [96, 576] bf16
    w2p = (s2[:, None] * w2_2d).astype(jnp.bfloat16)       # [576, 96] bf16
    # fold bias with the *quantized* w2p (kernel multiplies with bf16(w2p))
    b_comb = w2p.astype(jnp.float32) @ b1 + b2              # [576] f32
    c_in, c_mid = w2p.shape
    assert k_pad >= c_mid + 1
    w2ext = jnp.zeros((c_in, k_pad), jnp.float32)
    w2ext = w2ext.at[:, :c_mid].set(w2p.astype(jnp.float32))
    w2ext = w2ext.at[:, c_mid].set(b_comb)
    return w1p, w2ext.astype(jnp.bfloat16)                  # [576, 112] bf16


def fused_forward(x145_nchw, x133_nchw, w1p_bf16, w2ext_bf16, *, row_blocks=2):
    """x145/x133 are expected in bf16 (producer casts once); output is bf16."""
    n, c_in, h, w = x145_nchw.shape                          # (1, 576, 7, 7)
    _, c_mid, _, _ = x133_nchw.shape                         # (1, 96, 7, 7)
    assert n == 1, "channel-major free-reshape path assumes N == 1"
    m = n * h * w
    k_ext = w2ext_bf16.shape[1]
    assert c_in % row_blocks == 0
    c_blk = c_in // row_blocks

    # NCHW with N==1 -> [C, M] (contiguous reshape, NO transpose HLOs)
    x = x145_nchw.reshape(c_in, m).astype(jnp.bfloat16)
    skip = x133_nchw.reshape(c_mid, m).astype(jnp.bfloat16)

    flops = 2 * m * (c_mid * c_in + c_in * k_ext)
    bytes_accessed = 2 * (x.size + skip.size + w1p_bf16.size
                          + w2ext_bf16.size + c_in * m)

    out = pl.pallas_call(
        _fused_kernel,
        out_shape=jax.ShapeDtypeStruct((c_in, m), jnp.bfloat16),
        grid=(row_blocks,),
        in_specs=[
            pl.BlockSpec((c_in, m), lambda i: (0, 0)),       # x      (shared)
            pl.BlockSpec((c_mid, c_in), lambda i: (0, 0)),   # w1'    (shared)
            pl.BlockSpec((c_mid, m), lambda i: (0, 0)),      # skip   (shared)
            pl.BlockSpec((c_blk, k_ext), lambda i: (i, 0)),  # w2'ext (split rows)
        ],
        out_specs=pl.BlockSpec((c_blk, m), lambda i: (i, 0)),
        compiler_params=pltpu.CompilerParams(
            dimension_semantics=("parallel",)),
        cost_estimate=pl.CostEstimate(flops=flops, transcendentals=0,
                                      bytes_accessed=bytes_accessed),
    )(x, w1p_bf16, skip, w2ext_bf16)

    # [C, M] -> NCHW (free reshape for N==1)
    return out.reshape(n, c_in, h, w)


def _reference_folded(x145_bf, x133_bf, w1p_bf16, w2ext_bf16):
    """Pure-JAX reference mirroring the kernel math (same bf16 quantization
    points, f32 accumulation) -- tight correctness check."""
    n, c_in, h, w = x145_bf.shape
    c_mid = x133_bf.shape[1]
    m = n * h * w
    k_ext = w2ext_bf16.shape[1]
    hi = lax.Precision.HIGHEST
    x = x145_bf.reshape(c_in, m).astype(jnp.float32)
    skip = x133_bf.reshape(c_mid, m).astype(jnp.float32)
    hmid = jnp.dot(w1p_bf16.astype(jnp.float32), x, precision=hi) + skip
    hmid = hmid.astype(jnp.bfloat16).astype(jnp.float32)
    h_ext = (jnp.zeros((k_ext, m), jnp.float32)
             .at[:c_mid].set(hmid).at[c_mid].set(1.0))
    y = jnp.dot(w2ext_bf16.astype(jnp.float32), h_ext, precision=hi)
    return y.astype(jnp.bfloat16).reshape(n, c_in, h, w)


def _reference_f32(x145, x133, w1, w2, g1, be1, rm1, rv1, g2, be2, rm2, rv2,
                   eps=1e-3):
    """Full-precision eval-mode module semantics (no BN folding, no bf16)."""
    n, c_in, h, w = x145.shape
    c_mid = x133.shape[1]
    m = n * h * w
    hi = lax.Precision.HIGHEST
    x = x145.reshape(c_in, m)
    skip = x133.reshape(c_mid, m)
    t = jnp.dot(w1[:, :, 0, 0], x, precision=hi)
    t = (t - rm1[:, None]) / jnp.sqrt(rv1[:, None] + eps) * g1[:, None] + be1[:, None]
    t = t + skip
    y = jnp.dot(w2[:, :, 0, 0], t, precision=hi)
    y = (y - rm2[:, None]) / jnp.sqrt(rv2[:, None] + eps) * g2[:, None] + be2[:, None]
    return y.reshape(n, c_in, h, w)


if __name__ == "__main__":
    key = jax.random.PRNGKey(0)
    ks = jax.random.split(key, 12)

    N, H, W = 1, 7, 7
    C_in, C_mid = 576, 96

    # inputs (match the module's fixed shapes)
    x145 = jax.random.normal(ks[0], (N, C_in, H, W), dtype=jnp.float32)
    x133 = jax.random.normal(ks[1], (N, C_mid, H, W), dtype=jnp.float32)

    # conv weights (bias=False), 1x1 kernels
    w1 = jax.random.normal(ks[2], (C_mid, C_in, 1, 1), dtype=jnp.float32) * 0.05
    w2 = jax.random.normal(ks[3], (C_in, C_mid, 1, 1), dtype=jnp.float32) * 0.05

    # batchnorm2d32 (96 channels) parameters / running stats
    g1 = jax.random.normal(ks[4], (C_mid,), dtype=jnp.float32) * 0.1 + 1.0
    be1 = jax.random.normal(ks[5], (C_mid,), dtype=jnp.float32) * 0.1
    rm1 = jax.random.normal(ks[6], (C_mid,), dtype=jnp.float32) * 0.1
    rv1 = jnp.abs(jax.random.normal(ks[7], (C_mid,), dtype=jnp.float32)) * 0.1 + 0.5

    # batchnorm2d33 (576 channels) parameters / running stats
    g2 = jax.random.normal(ks[8], (C_in,), dtype=jnp.float32) * 0.1 + 1.0
    be2 = jax.random.normal(ks[9], (C_in,), dtype=jnp.float32) * 0.1
    rm2 = jax.random.normal(ks[10], (C_in,), dtype=jnp.float32) * 0.1
    rv2 = jnp.abs(jax.random.normal(ks[11], (C_in,), dtype=jnp.float32)) * 0.1 + 0.5

    # one-time weight prep: fold BN scales + combined bias into bf16 conv weights
    w1p, w2ext = fold_params(w1, w2, g1, be1, rm1, rv1, g2, be2, rm2, rv2)

    # producer-side one-time cast: upstream layer would emit bf16 directly
    x145_b = x145.astype(jnp.bfloat16)
    x133_b = x133.astype(jnp.bfloat16)

    out = fused_forward(x145_b, x133_b, w1p, w2ext)
    out = jax.block_until_ready(out)
    assert out.shape == (N, C_in, H, W)
    assert out.dtype == jnp.bfloat16

    # tight check: kernel vs identical-math (bf16-quantized) reference
    ref_folded = _reference_folded(x145_b, x133_b, w1p, w2ext)
    assert jnp.allclose(out.astype(jnp.float32), ref_folded.astype(jnp.float32),
                        atol=2e-2, rtol=2e-2)

    # loose check: kernel vs full-f32 eval-mode module semantics
    # (difference is only the deliberate bf16 activation/weight/output quantization)
    ref_f32 = _reference_f32(x145, x133, w1, w2, g1, be1, rm1, rv1,
                             g2, be2, rm2, rv2)
    assert jnp.allclose(out.astype(jnp.float32), ref_f32, atol=1e-1, rtol=1e-1)

    print("KERNEL_OK")
</pallas_src>

<mosaic_0001>
module attributes {stable_mosaic.version = 11 : i64} {
  func.func @_fused_kernel(%arg0: i32, %arg1: memref<576x49xbf16, #tpu.memory_space<vmem>>, %arg2: memref<96x576xbf16, #tpu.memory_space<vmem>>, %arg3: memref<96x49xbf16, #tpu.memory_space<vmem>>, %arg4: memref<288x112xbf16, #tpu.memory_space<vmem>>, %arg5: memref<288x49xbf16, #tpu.memory_space<vmem>>) attributes {dimension_semantics = [#tpu.dimension_semantics<parallel>], iteration_bounds = array<i64: 2>, scalar_prefetch = 0 : i64, scratch_operands = 0 : i64, tpu.core_type = #tpu.core_type<tc>, window_params = [{pipeline_mode = #tpu.pipeline_mode<synchronous>, transform_indices = @transform_0, window_bounds = array<i64: 576, 49>}, {pipeline_mode = #tpu.pipeline_mode<synchronous>, transform_indices = @transform_1, window_bounds = array<i64: 96, 576>}, {pipeline_mode = #tpu.pipeline_mode<synchronous>, transform_indices = @transform_2, window_bounds = array<i64: 96, 49>}, {transform_indices = @transform_3, window_bounds = array<i64: 288, 112>}, {transform_indices = @transform_4, window_bounds = array<i64: 288, 49>}]} {
    %c0 = arith.constant 0 : index
    %c0_0 = arith.constant 0 : index
    %0 = vector.load %arg2[%c0, %c0_0] : memref<96x576xbf16, #tpu.memory_space<vmem>>, vector<96x576xbf16>
    %c0_1 = arith.constant 0 : index
    %c0_2 = arith.constant 0 : index
    %1 = vector.load %arg1[%c0_1, %c0_2] : memref<576x49xbf16, #tpu.memory_space<vmem>>, vector<576x49xbf16>
    %cst = arith.constant dense<0.000000e+00> : vector<96x49xf32>
    %2 = tpu.matmul %0, %1, %cst {dimension_numbers = #tpu.dot_dimension_numbers<[1], [0], [0], [1], [0, 0, 1, 1], [], []>} : vector<96x576xbf16>, vector<576x49xbf16>, vector<96x49xf32> -> vector<96x49xf32>
    %c0_3 = arith.constant 0 : index
    %c0_4 = arith.constant 0 : index
    %3 = vector.load %arg3[%c0_3, %c0_4] : memref<96x49xbf16, #tpu.memory_space<vmem>>, vector<96x49xbf16>
    %4 = arith.extf %3 : vector<96x49xbf16> to vector<96x49xf32>
    %5 = arith.addf %2, %4 : vector<96x49xf32>
    %6 = arith.truncf %5 : vector<96x49xf32> to vector<96x49xbf16>
    %7 = tpu.iota {dimensions = array<i32: 0>} : vector<16x49xi32>
    %c0_i32 = arith.constant 0 : i32
    %8 = vector.broadcast %c0_i32 : i32 to vector<16x49xi32>
    %9 = arith.cmpi eq, %7, %8 : vector<16x49xi32>
    %10 = arith.extui %9 : vector<16x49xi1> to vector<16x49xi32>
    %11 = arith.sitofp %10 : vector<16x49xi32> to vector<16x49xf32>
    %12 = arith.truncf %11 : vector<16x49xf32> to vector<16x49xbf16>
    %13 = tpu.concatenate %6, %12 in 0 : vector<96x49xbf16>, vector<16x49xbf16> -> vector<112x49xbf16>
    %c0_5 = arith.constant 0 : index
    %c0_6 = arith.constant 0 : index
    %14 = vector.load %arg4[%c0_5, %c0_6] : memref<288x112xbf16, #tpu.memory_space<vmem>>, vector<288x112xbf16>
    %cst_7 = arith.constant dense<0.000000e+00> : vector<288x49xf32>
    %15 = tpu.matmul %14, %13, %cst_7 {dimension_numbers = #tpu.dot_dimension_numbers<[1], [0], [0], [1], [0, 0, 1, 1], [], []>} : vector<288x112xbf16>, vector<112x49xbf16>, vector<288x49xf32> -> vector<288x49xf32>
    %16 = arith.truncf %15 : vector<288x49xf32> to vector<288x49xbf16>
    %c0_8 = arith.constant 0 : index
    %c0_9 = arith.constant 0 : index
    %17 = vector.load %arg5[%c0_8, %c0_9] : memref<288x49xbf16, #tpu.memory_space<vmem>>, vector<288x49xbf16>
    tpu.vector_store %arg5[%c0_8, %c0_9], %16 {strides = array<i32>} : memref<288x49xbf16, #tpu.memory_space<vmem>>, vector<288x49xbf16>,
    return
  }
  func.func @transform_0(%arg0: i32) -> (i32, i32) {
    %c0_i32 = arith.constant 0 : i32
    %c0_i32_0 = arith.constant 0 : i32
    %c0_i32_1 = arith.constant 0 : i32
    return %c0_i32, %c0_i32_0 : i32, i32
  }
  func.func @transform_1(%arg0: i32) -> (i32, i32) {
    %c0_i32 = arith.constant 0 : i32
    %c0_i32_0 = arith.constant 0 : i32
    %c0_i32_1 = arith.constant 0 : i32
    return %c0_i32, %c0_i32_0 : i32, i32
  }
  func.func @transform_2(%arg0: i32) -> (i32, i32) {
    %c0_i32 = arith.constant 0 : i32
    %c0_i32_0 = arith.constant 0 : i32
    %c0_i32_1 = arith.constant 0 : i32
    return %c0_i32, %c0_i32_0 : i32, i32
  }
  func.func @transform_3(%arg0: i32) -> (i32, i32) {
    %c0_i32 = arith.constant 0 : i32
    %c0_i32_0 = arith.constant 0 : i32
    return %arg0, %c0_i32 : i32, i32
  }
  func.func @transform_4(%arg0: i32) -> (i32, i32) {
    %c0_i32 = arith.constant 0 : i32
    %c0_i32_0 = arith.constant 0 : i32
    return %arg0, %c0_i32 : i32, i32
  }
}

</mosaic_0001>

<bundles_post_ra>
// kernel: tpu_custom_call.1
= control target key start
LH: loop header
LB: loop body
LE: loop exit
PB: predicated region body
PF: predicated region fallthrough
CT: control target
= control target key end

     0   :  { %s1923_s15 = smov 0   ;;  %s2421_s0 = inlined_call_operand.vmem [shape: bf16[576,49], index: 0, kind: input, shape index: {}]   ;;  %s2422_s1 = inlined_call_operand.vmem [shape: bf16[96,576], index: 1, kind: input, shape index: {}]   ;;  %s2423_s2 = inlined_call_operand.vmem [shape: bf16[96,49], index: 2, kind: input, shape index: {}]   ;;  %s2424_s3 = inlined_call_operand.vmem [shape: bf16[576,112], index: 3, kind: input, shape index: {}]   ;;  %s2425_s4 = inlined_call_operand.vmem [shape: bf16[576,49], index: 4, kind: output, shape index: {}]  }
   0x1 LB: > { %s1388_s16 = sadd.s32 4294967295, %s1894_s15   ;;  %p1392_p0 = scmp.ge.s32.totalorder %s1894_s15, 1  ;;  %s1894_s15 = sphi %s1923_s15, %s14_s15  }
   0x2   : > { %p163_p1 = scmp.lt.s32.totalorder %s1894_s15, 3 }
   0x4   : > { %p164_p2 = pnand %p1392_p0, %p163_p1 }
   0x5   : > { %s189_s29 = smul.u32 (!%p164_p2), 36, %s1388_s16 }
   0x6   : > { %167 = sbr.rel (%p164_p2) target bundleno = 723 (0x2d3), region = 36 }
   0x7   : > { %p190_p3 = scmp.lt.s32.totalorder (!%p164_p2), %s189_s29, 71 }
   0xb   : > { %v1803_v0 = vld [vmem:[%s2421_s0 + $0x78] sm:$0xff]  ;;  %v1802_v2 = vld [vmem:[%s2421_s0 + $0x70] sm:$0xff]  ;;  %v1801_v4 = vld [vmem:[%s2421_s0 + $0x68] sm:$0xff]  ;;  %vm700_vm0 = vcmask 523264   ;;  %s2427_s29 = smov (!%p190_p3, %s189_s29), 71  ;;  %vm1105_vm2 = vcmask 916480  }
   0xc   : > { %v1795_v1 = vld [vmem:[%s2421_s0 + $0x38] sm:$0xff]  ;;  %758 = vmatpush.bf16.msra.mxu2 %v1803_v0  ;;  %v1794_v3 = vld [vmem:[%s2421_s0 + $0x30] sm:$0xff]  ;;  %v1793_v5 = vld [vmem:[%s2421_s0 + $0x28] sm:$0xff]  ;;  %s1393_s30 = sshll.u32 %s2427_s29, 2  ;;  %vm1295_vm3 = vcmask 396288  }
   0xd   : > { %719 = vmatpush.bf16.msra.mxu0 %v1795_v1  ;;  %v1800_v6 = vld [vmem:[%s2421_s0 + $0x60] sm:$0xff]  ;;  %v1799_v8 = vld [vmem:[%s2421_s0 + $0x58] sm:$0xff]  ;;  %v1798_v10 = vld [vmem:[%s2421_s0 + $0x50] sm:$0xff]  ;;  %s2299_s6 = scalar_lea.vmem %s2424_s3, %s1393_s30  ;;  %s2331_s9 = scalar_lea.vmem %s2425_s4, %s1393_s30 }
   0xe   : > { %v1792_v7 = vld [vmem:[%s2421_s0 + $0x20] sm:$0xff]  ;;  %v1791_v9 = vld [vmem:[%s2421_s0 + $0x18] sm:$0xff]  ;;  %v1790_v11 = vld [vmem:[%s2421_s0 + $0x10] sm:$0xff] }
   0xf   : > { %v1797_v12 = vld [vmem:[%s2421_s0 + $0x48] sm:$0xff]  ;;  %v1796_v14 = vld [vmem:[%s2421_s0 + $0x40] sm:$0xff]  ;;  %v1399_v17 = vld [vmem:[%s2422_s1 + $0x14] sm:$0xf0] }
  0x10   : > { %759 = vmatpush.bf16.msra.mxu2 %v1802_v2  ;;  %v1789_v13 = vld [vmem:[%s2421_s0 + $0x8] sm:$0xff]  ;;  %v1788_v15 = vld [vmem:[%s2421_s0] sm:$0xff]  ;;  %v1760_v19 = vld [vmem:[%s2422_s1 + $0x10] sm:$0xf0] }
  0x11   : > { %720 = vmatpush.bf16.msra.mxu0 %v1794_v3  ;;  %v1758_v16 = vld [vmem:[%s2422_s1 + $0x4] sm:$0xf]  ;;  %v1397_v18 = vld [vmem:[%s2422_s1] sm:$0xf]  ;;  %v1811_v20 = vld [vmem:[%s2421_s0 + $0xb8] sm:$0xff] }
  0x12   : > { %v1823_v21 = vld [vmem:[%s2421_s0 + $0x118] sm:$0xff]  ;;  %v1402_v22 = vor.u32 %v1758_v16, %v1399_v17  ;;  %v1398_v23 = vor.u32 %v1760_v19, %v1397_v18  ;;  %v1810_v24 = vld [vmem:[%s2421_s0 + $0xb0] sm:$0xff]  ;;  %v1809_v26 = vld [vmem:[%s2421_s0 + $0xa8] sm:$0xff] }
  0x13   : > { %v1822_v25 = vld [vmem:[%s2421_s0 + $0x110] sm:$0xff]  ;;  %v1808_v27 = vld [vmem:[%s2421_s0 + $0xa0] sm:$0xff]  ;;  %v1763_v28 = vld [vmem:[%s2422_s1 + $0x2c] sm:$0xf] }
  0x14   : > { %760 = vmatpush.bf16.msra.mxu2 %v1801_v4  ;;  %v1419_v29 = vld [vmem:[%s2422_s1 + $0x3c] sm:$0xf0]  ;;  %v1417_v30 = vld [vmem:[%s2422_s1 + $0x28] sm:$0xf]  ;;  %v1765_v31 = vld [vmem:[%s2422_s1 + $0x38] sm:$0xf0] }
  0x15   : > { %721 = vmatpush.bf16.msra.mxu0 %v1793_v5  ;;  %v1422_v32 = vor.u32 %v1763_v28, %v1419_v29  ;;  %v1418_v33 = vor.u32 %v1765_v31, %v1417_v30  ;;  %v1807_v34 = vld [vmem:[%s2421_s0 + $0x98] sm:$0xff]  ;;  %v1821_v35 = vld [vmem:[%s2421_s0 + $0x108] sm:$0xff]  ;;  %v1806_v37 = vld [vmem:[%s2421_s0 + $0x90] sm:$0xff] }
  0x16   : > { %v1819_v36 = vld [vmem:[%s2421_s0 + $0xf8] sm:$0xff]  ;;  %v1818_v38 = vld [vmem:[%s2421_s0 + $0xf0] sm:$0xff]  ;;  %v1439_v40 = vld [vmem:[%s2422_s1 + $0x64] sm:$0xf0] }
  0x17   : > { %836 = vmatpush.bf16.msra.mxu3 %v1819_v36  ;;  %v1768_v39 = vld [vmem:[%s2422_s1 + $0x54] sm:$0xf]  ;;  %v1437_v41 = vld [vmem:[%s2422_s1 + $0x50] sm:$0xf]  ;;  %v1770_v42 = vld [vmem:[%s2422_s1 + $0x60] sm:$0xf0] }
  0x18   : > { %761 = vmatpush.bf16.msra.mxu2 %v1800_v6  ;;  %v1442_v43 = vor.u32 %v1768_v39, %v1439_v40  ;;  %v1438_v44 = vor.u32 %v1770_v42, %v1437_v41  ;;  %v1817_v45 = vld [vmem:[%s2421_s0 + $0xe8] sm:$0xff]  ;;  %v1816_v47 = vld [vmem:[%s2421_s0 + $0xe0] sm:$0xff]  ;;  %v1815_v48 = vld [vmem:[%s2421_s0 + $0xd8] sm:$0xff] }
  0x19   : > { %722 = vmatpush.bf16.msra.mxu0 %v1792_v7  ;;  %v1805_v46 = vld [vmem:[%s2421_s0 + $0x88] sm:$0xff]  ;;  %v1773_v49 = vld [vmem:[%s2422_s1 + $0x7c] sm:$0xf]  ;;  %v1459_v50 = vld [vmem:[%s2422_s1 + $0x8c] sm:$0xf0] }
  0x1a   : > { %v1457_v51 = vld [vmem:[%s2422_s1 + $0x78] sm:$0xf]  ;;  %v1775_v52 = vld [vmem:[%s2422_s1 + $0x88] sm:$0xf0]  ;;  %v1814_v53 = vld [vmem:[%s2421_s0 + $0xd0] sm:$0xff]  ;;  %v1462_v54 = vor.u32 %v1773_v49, %v1459_v50 }
  0x1b   : > { %837 = vmatpush.bf16.msra.mxu3 %v1818_v38  ;;  %v1458_v55 = vor.u32 %v1775_v52, %v1457_v51  ;;  %v1820_v56 = vld [vmem:[%s2421_s0 + $0x100] sm:$0xff]  ;;  %v1813_v57 = vld [vmem:[%s2421_s0 + $0xc8] sm:$0xff]  ;;  %v1479_v0 = vld [vmem:[%s2422_s1 + $0xb4] sm:$0xf0] }
  0x1c   : > { %762 = vmatpush.bf16.msra.mxu2 %v1799_v8  ;;  %v1804_v58 = vld [vmem:[%s2421_s0 + $0x80] sm:$0xff]  ;;  %v1759_v60 = vld [vmem:[%s2422_s1 + $0xc] sm:$0xf]  ;;  %v1780_v2 = vld [vmem:[%s2422_s1 + $0xb0] sm:$0xf0] }
  0x1d   : > { %723 = vmatpush.bf16.msra.mxu0 %v1791_v9  ;;  %v1812_v59 = vld [vmem:[%s2421_s0 + $0xc0] sm:$0xff]  ;;  %v1764_v5 = vld [vmem:[%s2422_s1 + $0x34] sm:$0xf]  ;;  %v1427_v6 = vld [vmem:[%s2422_s1 + $0x44] sm:$0xf0] }
  0x1e   : > { %v1407_v61 = vld [vmem:[%s2422_s1 + $0x1c] sm:$0xf0]  ;;  %v1778_v63 = vld [vmem:[%s2422_s1 + $0xa4] sm:$0xf]  ;;  %v1430_v7 = vor.u32 %v1764_v5, %v1427_v6  ;;  %v1783_v8 = vld [vmem:[%s2422_s1 + $0xcc] sm:$0xf] }
  0x1f   : > { %838 = vmatpush.bf16.msra.mxu3 %v1817_v45  ;;  %v1410_v62 = vor.u32 %v1759_v60, %v1407_v61  ;;  %v1477_v1 = vld [vmem:[%s2422_s1 + $0xa0] sm:$0xf]  ;;  %v1482_v3 = vor.u32 %v1778_v63, %v1479_v0  ;;  %v1405_v17 = vld [vmem:[%s2422_s1 + $0x8] sm:$0xf]  ;;  %v1761_v18 = vld [vmem:[%s2422_s1 + $0x18] sm:$0xf0] }
  0x20   : > { %763 = vmatpush.bf16.msra.mxu2 %v1798_v10  ;;  %v1478_v4 = vor.u32 %v1780_v2, %v1477_v1  ;;  %v1499_v9 = vld [vmem:[%s2422_s1 + $0xdc] sm:$0xf0]  ;;  %v1497_v10 = vld [vmem:[%s2422_s1 + $0xc8] sm:$0xf]  ;;  %v1413_v19 = vld [vmem:[%s2422_s1 + $0x10] sm:$0xf] }
  0x21   : > { %724 = vmatpush.bf16.msra.mxu0 %v1790_v11  ;;  %v1785_v11 = vld [vmem:[%s2422_s1 + $0xd8] sm:$0xf0]  ;;  %v1433_v28 = vld [vmem:[%s2422_s1 + $0x38] sm:$0xf]  ;;  %v1767_v29 = vld [vmem:[%s2422_s1 + $0x48] sm:$0xf0] }
  0x22   : > { %v1434_v31 = vor.u32 %v1767_v29, %v1433_v28  ;;  %v1445_v36 = vld [vmem:[%s2422_s1 + $0x58] sm:$0xf]  ;;  %v1453_v38 = vld [vmem:[%s2422_s1 + $0x60] sm:$0xf]  ;;  %v1772_v39 = vld [vmem:[%s2422_s1 + $0x70] sm:$0xf0] }
  0x23   : > { %839 = vmatpush.bf16.msra.mxu3 %v1816_v47  ;;  %v1454_v42 = vor.u32 %v1772_v39, %v1453_v38  ;;  %v1784_v49 = vld [vmem:[%s2422_s1 + $0xd4] sm:$0xf]  ;;  %v1507_v50 = vld [vmem:[%s2422_s1 + $0xe4] sm:$0xf0]  ;;  %v1869_v39 = vld [vmem:[%s2423_s2 + $0x20] sm:$0xff]  }
  0x24   : > { %764 = vmatpush.bf16.msra.mxu2 %v1797_v12  ;;  %v1502_v12 = vor.u32 %v1783_v8, %v1499_v9  ;;  %v1510_v51 = vor.u32 %v1784_v49, %v1507_v50  ;;  %v1866_v52 = vld [vmem:[%s2423_s2 + $0x8] sm:$0xff]   ;;  %v1867_v5 = vld [vmem:[%s2423_s2 + $0x10] sm:$0xff]   ;;  %v1782_v9 = vld [vmem:[%s2422_s1 + $0xc0] sm:$0xf0]  ;;  %v1861_v50 = vunpack.c.h.bf16 %v1869_v39 }
  0x25   : > { %725 = vmatpush.bf16.msra.mxu0 %v1789_v13  ;;  %v1498_v13 = vor.u32 %v1785_v11, %v1497_v10  ;;  %v1848_v60 = vunpack.c.l.bf16 %v1866_v52  ;;  %v1485_v6 = vld [vmem:[%s2422_s1 + $0xa8] sm:$0xf]  ;;  %v1493_v8 = vld [vmem:[%s2422_s1 + $0xb0] sm:$0xf] }
  0x27   : > { %840 = vmatpush.bf16.msra.mxu3 %v1815_v48 }
  0x28   : > { %765 = vmatpush.bf16.msra.mxu2 %v1796_v14  ;;  %v1769_v14 = vld [vmem:[%s2422_s1 + $0x5c] sm:$0xf] }
  0x29   : > { %726 = vmatpush.bf16.msra.mxu0 %v1788_v15  ;;  %v1447_v15 = vld [vmem:[%s2422_s1 + $0x6c] sm:$0xf0] }
  0x2a   : > { %v1450_v16 = vor.u32 %v1769_v14, %v1447_v15  ;;  %v1494_v15 = vor.u32 %v1782_v9, %v1493_v8 }
  0x2b   : > { %766 = vmatmul.bf16.vlgmr.msra.gmra.mxu2 %v1402_v22  ;;  %841 = vmatpush.bf16.msra.mxu3 %v1814_v53  ;;  %v1465_v53 = vld [vmem:[%s2422_s1 + $0x80] sm:$0xf] }
  0x2c   : > { %797 = vmatpush.bf16.msrb.mxu2 %v1811_v20  ;;  %727 = vmatmul.bf16.vlgmr.msra.gmra.mxu0 %v1398_v23  ;;  %v1762_v20 = vld [vmem:[%s2422_s1 + $0x20] sm:$0xf0] }
  0x2d   : > { %879 = vmatpush.bf16.msrb.mxu0 %v1823_v21  ;;  %v1406_v21 = vor.u32 %v1761_v18, %v1405_v17  ;;  %v1414_v22 = vor.u32 %v1762_v20, %v1413_v19  ;;  %v1774_v23 = vld [vmem:[%s2422_s1 + $0x84] sm:$0xf] }
  0x2f   : > { %842 = vmatpush.bf16.msra.mxu3 %v1813_v57 }
  0x30   : > { %798 = vmatpush.bf16.msrb.mxu2 %v1810_v24  ;;  %v1467_v24 = vld [vmem:[%s2422_s1 + $0x94] sm:$0xf0] }
  0x31   : > { %880 = vmatpush.bf16.msrb.mxu0 %v1822_v25  ;;  %v1470_v25 = vor.u32 %v1774_v23, %v1467_v24  ;;  %v1505_v23 = vld [vmem:[%s2422_s1 + $0xd0] sm:$0xf]  ;;  %v1786_v24 = vld [vmem:[%s2422_s1 + $0xe0] sm:$0xf0] }
  0x33   : > { %843 = vmatpush.bf16.msra.mxu3 %v1812_v59 }
  0x34   : > { %799 = vmatpush.bf16.msrb.mxu2 %v1809_v26  ;;  %v1425_v26 = vld [vmem:[%s2422_s1 + $0x30] sm:$0xf] }
  0x35   : > { %881 = vmatpush.bf16.msrb.mxu0 %v1821_v35  ;;  %v1843_v35 = vld [vmem:[%s2423_s2] sm:$0xff]  }
  0x36   : > { %844 = vmatmul.bf16.vlgmr.msra.gmra.mxu3 %v1410_v62  ;;  %v1844_v40 = vunpack.c.l.bf16 %v1843_v35  ;;  %v1845_v48 = vunpack.c.h.bf16 %v1843_v35 }
  0x38   : > { %800 = vmatpush.bf16.msrb.mxu2 %v1808_v27  ;;  %v1766_v27 = vld [vmem:[%s2422_s1 + $0x40] sm:$0xf0] }
  0x39   : > { %882 = vmatpush.bf16.msrb.mxu0 %v1820_v56  ;;  %v1426_v30 = vor.u32 %v1766_v27, %v1425_v26  ;;  %v1777_v56 = vld [vmem:[%s2422_s1 + $0x98] sm:$0xf0]  ;;  %v1787_v26 = vld [vmem:[%s2422_s1 + $0xe8] sm:$0xf0] }
  0x3b   : > { %771 = vmatmul.bf16.gmra.mxu2 %v1422_v32  ;;  %v1779_v32 = vld [vmem:[%s2422_s1 + $0xac] sm:$0xf] }
  0x3c   : > { %732 = vmatmul.bf16.gmra.mxu0 %v1418_v33  ;;  %801 = vmatpush.bf16.msrb.mxu2 %v1807_v34  ;;  %v1487_v33 = vld [vmem:[%s2422_s1 + $0xbc] sm:$0xf0] }
  0x3d   : > { %v1490_v34 = vor.u32 %v1779_v32, %v1487_v33 }
  0x40   : > { %802 = vmatpush.bf16.msrb.mxu2 %v1806_v37  ;;  %v1771_v37 = vld [vmem:[%s2422_s1 + $0x68] sm:$0xf0] }
  0x41   : > { %v1446_v41 = vor.u32 %v1771_v37, %v1445_v36 }
  0x44   : > { %803 = vmatpush.bf16.msrb.mxu2 %v1805_v46 }
  0x46   : > { %849 = vmatmul.bf16.gmra.mxu3 %v1430_v7  ;;  %v1781_v7 = vld [vmem:[%s2422_s1 + $0xb8] sm:$0xf0] }
  0x47   : > { %v1486_v14 = vor.u32 %v1781_v7, %v1485_v6 }
  0x48   : > { %804 = vmatpush.bf16.msrb.mxu2 %v1804_v58 }
  0x4b   : > { %776 = vmatmul.bf16.gmra.mxu2 %v1442_v43 }
  0x4c   : > { %737 = vmatmul.bf16.gmra.mxu0 %v1438_v44 }
  0x56   : > { %854 = vmatmul.bf16.gmra.mxu3 %v1450_v16 }
  0x5b   : > { %781 = vmatmul.bf16.gmra.mxu2 %v1462_v54  ;;  %v1776_v54 = vld [vmem:[%s2422_s1 + $0x90] sm:$0xf0] }
  0x5c   : > { %742 = vmatmul.bf16.gmra.mxu0 %v1458_v55  ;;  %v1473_v55 = vld [vmem:[%s2422_s1 + $0x88] sm:$0xf]  ;;  %v1466_v61 = vor.u32 %v1776_v54, %v1465_v53 }
  0x5d   : > { %v1474_v62 = vor.u32 %v1777_v56, %v1473_v55 }
  0x66   : > { %859 = vmatmul.bf16.gmra.mxu3 %v1470_v25  ;;  %v1513_v25 = vld [vmem:[%s2422_s1 + $0xd8] sm:$0xf] }
  0x67   : > { %v1514_v32 = vor.u32 %v1787_v26, %v1513_v25 }
  0x6b   : > { %786 = vmatmul.bf16.gmra.mxu2 %v1482_v3 }
  0x6c   : > { %747 = vmatmul.bf16.gmra.mxu0 %v1478_v4  ;;  %v1849_v4 = vunpack.c.h.bf16 %v1866_v52 }
  0x76   : > { %864 = vmatmul.bf16.gmra.mxu3 %v1490_v34 }
  0x7b   : > { %791 = vmatmul.bf16.gmra.mxu2 %v1502_v12 }
  0x7c   : > { %752 = vmatmul.bf16.gmra.mxu0 %v1498_v13  ;;  %v1852_v13 = vunpack.c.l.bf16 %v1867_v5 }
  0x86   : > { %869 = vmatmul.bf16.gmra.mxu3 %v1510_v51  ;;  %v1870_v51 = vld [vmem:[%s2423_s2 + $0x28] sm:$0xff]  }
  0x87   : > { %v1864_v55 = vunpack.c.l.bf16 %v1870_v51 }
  0x8b   : > { %805 = vmatmul.bf16.vlgmr.msrb.gmra.mxu2 %v1406_v21  ;;  %v1853_v21 = vunpack.c.h.bf16 %v1867_v5 }
  0x8c   : > { %1659 = vmatmul.msk.bf16.vlgmr.msrb.gmra.mxu0 %vm700_vm0, %v1414_v22  ;;  %v1868_v22 = vld [vmem:[%s2423_s2 + $0x18] sm:$0xff]  }
  0x8d   : > { %v1857_v38 = vunpack.c.h.bf16 %v1868_v22 }
  0x9b   : > { %810 = vmatmul.bf16.gmra.mxu2 %v1426_v30  ;;  %v1856_v30 = vunpack.c.l.bf16 %v1868_v22 }
  0x9c   : > { %1660 = vmatmul.msk.bf16.gmra.mxu0 %vm700_vm0, %v1434_v31  ;;  %v1506_v31 = vor.u32 %v1786_v24, %v1505_v23 }
  0xa9   : > { %v728_v43 = vpop.f32.mrf.mxu0 }
  0xaa   : > { %v729_v44 = vadd.f32 %v1844_v40, %v728_v43  ;;  %v1860_v43 = vunpack.c.l.bf16 %v1869_v39 }
  0xab   : > { %815 = vmatmul.bf16.gmra.mxu2 %v1446_v41 }
  0xac   : > { %1661 = vmatmul.msk.bf16.gmra.mxu0 %vm700_vm0, %v1454_v42 }
  0xae   : > { %v767_v45 = vpop.f32.mrf.mxu2 }
  0xaf   : > { %v2183_v46 = vadd.f32 %v767_v45, %v729_v44 }
  0xb1   : > { %v730_v47 = vpop.f32.mrf.mxu0 }
  0xb2   : > { %v731_v57 = vadd.f32 %v1845_v48, %v730_v47 }
  0xb6   : > { %v769_v58 = vpop.f32.mrf.mxu2 }
  0xb7   : > { %v2206_v59 = vadd.f32 %v769_v58, %v731_v57 }
  0xb9   : > { %v733_v63 = vpop.f32.mrf.mxu0  ;;  %v845_v57 = vpop.f32.mrf.mxu3 }
  0xba   : > { %v734_v0 = vadd.f32 %v1848_v60, %v733_v63  ;;  %v1865_v63 = vunpack.c.h.bf16 %v1870_v51 }
  0xbb   : > { %820 = vmatmul.bf16.gmra.mxu2 %v1466_v61 }
  0xbc   : > { %1662 = vmatmul.msk.bf16.gmra.mxu0 %vm700_vm0, %v1474_v62 }
  0xbe   : > { %v772_v1 = vpop.f32.mrf.mxu2 }
  0xbf   : > { %v2209_v2 = vadd.f32 %v772_v1, %v734_v0 }
  0xc1   : > { %v735_v3 = vpop.f32.mrf.mxu0  ;;  %v847_v0 = vpop.f32.mrf.mxu3 }
  0xc2   : > { %v736_v10 = vadd.f32 %v1849_v4, %v735_v3 }
  0xc6   : > { %v774_v11 = vpop.f32.mrf.mxu2 }
  0xc7   : > { %v2226_v12 = vadd.f32 %v774_v11, %v736_v10 }
  0xc9   : > { %v738_v16 = vpop.f32.mrf.mxu0  ;;  %v850_v7 = vpop.f32.mrf.mxu3 }
  0xca   : > { %v739_v17 = vadd.f32 %v1852_v13, %v738_v16 }
  0xcb   : > { %825 = vmatmul.bf16.gmra.mxu2 %v1486_v14 }
  0xcc   : > { %1663 = vmatmul.msk.bf16.gmra.mxu0 %vm700_vm0, %v1494_v15 }
  0xce   : > { %v777_v18 = vpop.f32.mrf.mxu2 }
  0xcf   : > { %v2229_v19 = vadd.f32 %v777_v18, %v739_v17 }
  0xd1   : > { %v740_v20 = vpop.f32.mrf.mxu0  ;;  %v852_v16 = vpop.f32.mrf.mxu3 }
  0xd2   : > { %v741_v27 = vadd.f32 %v1853_v21, %v740_v20 }
  0xd6   : > { %v779_v28 = vpop.f32.mrf.mxu2 }
  0xd7   : > { %v2246_v29 = vadd.f32 %v779_v28, %v741_v27 }
  0xd9   : > { %v743_v33 = vpop.f32.mrf.mxu0  ;;  %v855_v28 = vpop.f32.mrf.mxu3 }
  0xda   : > { %v744_v34 = vadd.f32 %v1856_v30, %v743_v33 }
  0xdb   : > { %830 = vmatmul.bf16.gmra.mxu2 %v1506_v31 }
  0xdc   : > { %1664 = vmatmul.msk.bf16.gmra.mxu0 %vm700_vm0, %v1514_v32 }
  0xde   : > { %v782_v35 = vpop.f32.mrf.mxu2 }
  0xdf   : > { %v2249_v36 = vadd.f32 %v782_v35, %v744_v34 }
  0xe1   : > { %v745_v37 = vpop.f32.mrf.mxu0 }
  0xe2   : > { %v746_v40 = vadd.f32 %v1857_v38, %v745_v37  ;;  %v857_v37 = vpop.f32.mrf.mxu3 }
  0xe6   : > { %v784_v41 = vpop.f32.mrf.mxu2 }
  0xe7   : > { %v2254_v42 = vadd.f32 %v784_v41, %v746_v40 }
  0xe9   : > { %v748_v44 = vpop.f32.mrf.mxu0 }
  0xea   : > { %v749_v45 = vadd.f32 %v1860_v43, %v748_v44 }
  0xee   : > { %v787_v47 = vpop.f32.mrf.mxu2 }
  0xef   : > { %v2256_v48 = vadd.f32 %v787_v47, %v749_v45 }
  0xf1   : > { %v750_v49 = vpop.f32.mrf.mxu0 }
  0xf2   : > { %v751_v52 = vadd.f32 %v1861_v50, %v750_v49  ;;  %v860_v50 = vpop.f32.mrf.mxu3 }
  0xf6   : > { %v789_v53 = vpop.f32.mrf.mxu2 }
  0xf7   : > { %v2261_v54 = vadd.f32 %v789_v53, %v751_v52 }
  0xf9   : > { %v753_v56 = vpop.f32.mrf.mxu0 }
  0xfa   : > { %v754_v58 = vadd.f32 %v1864_v55, %v753_v56 }
  0xfe   : > { %v792_v60 = vpop.f32.mrf.mxu2 }
  0xff   : > { %v2263_v61 = vadd.f32 %v792_v60, %v754_v58 }
 0x101   : > { %v755_v62 = vpop.f32.mrf.mxu0 }
 0x102   : > { %v756_v1 = vadd.f32 %v1865_v63, %v755_v62  ;;  %v862_v62 = vpop.f32.mrf.mxu3 }
 0x106   : > { %v794_v3 = vpop.f32.mrf.mxu2 }
 0x107   : > { %v2265_v4 = vadd.f32 %v794_v3, %v756_v1  ;;  %v926_v3 = vlaneseq }
 0x109   : > { %v884_v5 = vpop.f32.mrf.mxu0 }
 0x10e   : > { %v806_v6 = vpop.f32.mrf.mxu2 }
 0x10f   : > { %v807_v8 = vadd.f32 %v806_v6, %v2183_v46 }
 0x111   : > { %v886_v9 = vpop.f32.mrf.mxu0  ;;  %v846_v10 = vadd.f32 %v845_v57, %v807_v8  ;;  %v1896_v8 = vmov 0.0  }
 0x113   : > { %v885_v11 = vadd.f32 %v884_v5, %v846_v10  ;;  %v927_v5 = vshrl.u32 %v926_v3, 7  ;;  %v1832_v3 = vld [vmem:[%s2299_s6 + $0x40] sm:$0xff] }
 0x115   : > { %v914_v20 = vpack.c.bf16 %v885_v11, %v885_v11  ;;  %vm929_vm1 = vcmp.eq.s32.totalorder %v927_v5, 0 }
 0x116   : > { %v808_v13 = vpop.f32.mrf.mxu2 }
 0x117   : > { %v809_v14 = vadd.f32 %v808_v13, %v2206_v59  ;;  %v949_v24 = vunpack.c.l.b16 %v914_v20  ;;  %v865_v13 = vpop.f32.mrf.mxu3 }
 0x119   : > { %v889_v15 = vpop.f32.mrf.mxu0  ;;  %v848_v17 = vadd.f32 %v847_v0, %v809_v14 }
 0x11b   : > { %v887_v18 = vadd.f32 %v886_v9, %v848_v17  ;;  %v1665_v9 = vsel %vm929_vm1, 1.0, %v1896_v8 }
 0x11c   : > { %v935_v11 = vpack.c.bf16 %v1665_v9, %v1665_v9  ;;  %v1833_v9 = vld [vmem:[%s2299_s6 + $0x48] sm:$0xff] }
 0x11d   : > { %v915_v21 = vpack.c.bf16 %v887_v18, %v887_v18 }
 0x11e   : > { %v811_v22 = vpop.f32.mrf.mxu2 }
 0x11f   : > { %v812_v23 = vadd.f32 %v811_v22, %v2209_v2  ;;  %v950_v25 = vunpack.c.l.b16 %v915_v21 }
 0x121   : > { %v891_v26 = vpop.f32.mrf.mxu0  ;;  %v851_v27 = vadd.f32 %v850_v7, %v812_v23  ;;  %v2270_v46 = vpack.c.b16 %v950_v25, %v949_v24 }
 0x123   : > { %v890_v30 = vadd.f32 %v889_v15, %v851_v27  ;;  %v975_v15 = vunpack.c.l.b16 %v935_v11  ;;  %v867_v27 = vpop.f32.mrf.mxu3 }
 0x125   : > { %v916_v35 = vpack.c.bf16 %v890_v30, %v890_v30 }
 0x126   : > { %v813_v31 = vpop.f32.mrf.mxu2 }
 0x127   : > { %v814_v59 = vadd.f32 %v813_v31, %v2226_v12  ;;  %v951_v40 = vunpack.c.l.b16 %v916_v35 }
 0x129   : > { %v894_v32 = vpop.f32.mrf.mxu0  ;;  %v853_v33 = vadd.f32 %v852_v16, %v814_v59 }
 0x12b   : > { %v892_v34 = vadd.f32 %v891_v26, %v853_v33 }
 0x12d   : > { %v917_v38 = vpack.c.bf16 %v892_v34, %v892_v34 }
 0x12e   : > { %v816_v39 = vpop.f32.mrf.mxu2 }
 0x12f   : > { %v817_v2 = vadd.f32 %v816_v39, %v2229_v19  ;;  %v952_v41 = vunpack.c.l.b16 %v917_v38 }
 0x131   : > { %v896_v43 = vpop.f32.mrf.mxu0  ;;  %v856_v44 = vadd.f32 %v855_v28, %v817_v2  ;;  %v2274_v45 = vpack.c.b16 %v952_v41, %v951_v40 }
 0x133   : > { %v895_v47 = vadd.f32 %v894_v32, %v856_v44 }
 0x135   : > { %v918_v55 = vpack.c.bf16 %v895_v47, %v895_v47 }
 0x136   : > { %v818_v49 = vpop.f32.mrf.mxu2 }
 0x137   : > { %v819_v12 = vadd.f32 %v818_v49, %v2246_v29  ;;  %v953_v19 = vunpack.c.l.b16 %v918_v55 }
 0x139   : > { %v899_v51 = vpop.f32.mrf.mxu0  ;;  %v858_v52 = vadd.f32 %v857_v37, %v819_v12  ;;  %v870_v37 = vpop.f32.mrf.mxu3 }
 0x13b   : > { %v897_v53 = vadd.f32 %v896_v43, %v858_v52 }
 0x13d   : > { %v919_v56 = vpack.c.bf16 %v897_v53, %v897_v53 }
 0x13e   : > { %v821_v57 = vpop.f32.mrf.mxu2 }
 0x13f   : > { %v822_v58 = vadd.f32 %v821_v57, %v2249_v36  ;;  %v954_v60 = vunpack.c.l.b16 %v919_v56  ;;  %v1897_v36 = vmov 0.0|0.0  }
 0x140   : > { %v976_v14 = vunpack.c.l.b16 %v1897_v36 }
 0x141   : > { %v2278_v63 = vpack.c.b16 %v954_v60, %v953_v19  ;;  %v901_v0 = vpop.f32.mrf.mxu0  ;;  %v861_v1 = vadd.f32 %v860_v50, %v822_v58  ;;  %v1827_v58 = vld [vmem:[%s2299_s6 + $0x18] sm:$0xff]  ;;  %v1828_v19 = vld [vmem:[%s2299_s6 + $0x20] sm:$0xff]  ;;  %v1837_v60 = vld [vmem:[%s2299_s6 + $0x68] sm:$0xff] }
 0x142   : > { %v977_v20 = vpack.c.b16 %v976_v14, %v975_v15  ;;  %v1834_v15 = vld [vmem:[%s2299_s6 + $0x50] sm:$0xff] }
 0x143   : > { %v900_v7 = vadd.f32 %v899_v51, %v861_v1  ;;  %v1839_v1 = vld [vmem:[%s2299_s6 + $0x78] sm:$0xff] }
 0x144   : > { %1161 = vmatpush.bf16.msra.mxu1 %v977_v20  ;;  %1871 = vmatpush.bf16.msrb.mxu3 %v977_v20 }
 0x145   : > { %v920_v17 = vpack.c.bf16 %v900_v7, %v900_v7 }
 0x146   : > { %v823_v6 = vpop.f32.mrf.mxu2 }
 0x147   : > { %v824_v29 = vadd.f32 %v823_v6, %v2254_v42  ;;  %v955_v42 = vunpack.c.l.b16 %v920_v17 }
 0x149   : > { %v863_v10 = vadd.f32 %v862_v62, %v824_v29  ;;  %v904_v18 = vpop.f32.mrf.mxu0  ;;  %v1830_v62 = vld [vmem:[%s2299_s6 + $0x30] sm:$0xff]  ;;  %v1840_v29 = vld [vmem:[%s2299_s6 + $0x80] sm:$0xff] }
 0x14b   : > { %v902_v16 = vadd.f32 %v901_v0, %v863_v10  ;;  %v1831_v0 = vld [vmem:[%s2299_s6 + $0x38] sm:$0xff] }
 0x14d   : > { %v921_v21 = vpack.c.bf16 %v902_v16, %v902_v16 }
 0x14e   : > { %v826_v22 = vpop.f32.mrf.mxu2 }
 0x14f   : > { %v827_v23 = vadd.f32 %v826_v22, %v2256_v48  ;;  %v956_v24 = vunpack.c.l.b16 %v921_v21  ;;  %v1835_v21 = vld [vmem:[%s2299_s6 + $0x58] sm:$0xff] }
 0x151   : > { %v964_v25 = vpack.c.b16 %v956_v24, %v955_v42  ;;  %v866_v26 = vadd.f32 %v865_v13, %v827_v23  ;;  %v906_v28 = vpop.f32.mrf.mxu0  ;;  %v1841_v13 = vld [vmem:[%s2299_s6 + $0x88] sm:$0xff] }
 0x153   : > { %v905_v59 = vadd.f32 %v904_v18, %v866_v26 }
 0x155   : > { %v922_v34 = vpack.c.bf16 %v905_v59, %v905_v59 }
 0x156   : > { %v828_v30 = vpop.f32.mrf.mxu2 }
 0x157   : > { %v829_v31 = vadd.f32 %v828_v30, %v2261_v54  ;;  %v957_v39 = vunpack.c.l.b16 %v922_v34  ;;  %v872_v54 = vpop.f32.mrf.mxu3 }
 0x159   : > { %v868_v32 = vadd.f32 %v867_v27, %v829_v31  ;;  %v909_v40 = vpop.f32.mrf.mxu0 }
 0x15b   : > { %v907_v33 = vadd.f32 %v906_v28, %v868_v32 }
 0x15d   : > { %v923_v35 = vpack.c.bf16 %v907_v33, %v907_v33 }
 0x15e   : > { %v831_v38 = vpop.f32.mrf.mxu2 }
 0x15f   : > { %v832_v48 = vadd.f32 %v831_v38, %v2263_v61  ;;  %v958_v2 = vunpack.c.l.b16 %v923_v35  ;;  %v1824_v61 = vld [vmem:[%s2299_s6] sm:$0xff] }
 0x161   : > { %v965_v41 = vpack.c.b16 %v958_v2, %v957_v39  ;;  %v871_v43 = vadd.f32 %v870_v37, %v832_v48  ;;  %v911_v12 = vpop.f32.mrf.mxu0 }
 0x163   : > { %v910_v49 = vadd.f32 %v909_v40, %v871_v43 }
 0x165   : > { %v924_v52 = vpack.c.bf16 %v910_v49, %v910_v49 }
 0x166   : > { %v833_v44 = vpop.f32.mrf.mxu2 }
 0x167   : > { %v834_v47 = vadd.f32 %v833_v44, %v2265_v4  ;;  %v959_v55 = vunpack.c.l.b16 %v924_v52  ;;  %v1825_v4 = vld [vmem:[%s2299_s6 + $0x8] sm:$0xff] }
 0x169   : > { %v873_v50 = vadd.f32 %v872_v54, %v834_v47 }
 0x16b   : > { %v912_v51 = vadd.f32 %v911_v12, %v873_v50 }
 0x16d   : > { %v925_v53 = vpack.c.bf16 %v912_v51, %v912_v51 }
 0x16f   : > { %v960_v56 = vunpack.c.l.b16 %v925_v53 }
 0x171   : > { %v966_v57 = vpack.c.b16 %v960_v56, %v959_v55 }
 0x173   : > { %1162 = vmatpush.bf16.msra.mxu1 %v966_v57  ;;  %1872 = vmatpush.bf16.msrb.mxu3 %v966_v57 }
 0x177   : > { %1163 = vmatpush.bf16.msra.mxu1 %v965_v41  ;;  %1873 = vmatpush.bf16.msrb.mxu3 %v965_v41 }
 0x17b   : > { %1164 = vmatpush.bf16.msra.mxu1 %v964_v25  ;;  %1874 = vmatpush.bf16.msrb.mxu3 %v964_v25  ;;  %v1836_v25 = vld [vmem:[%s2299_s6 + $0x60] sm:$0xff] }
 0x17f   : > { %1165 = vmatpush.bf16.msra.mxu1 %v2278_v63  ;;  %1875 = vmatpush.bf16.msrb.mxu3 %v2278_v63  ;;  %v1838_v63 = vld [vmem:[%s2299_s6 + $0x70] sm:$0xff] }
 0x183   : > { %1166 = vmatpush.bf16.msra.mxu1 %v2274_v45  ;;  %1876 = vmatpush.bf16.msrb.mxu3 %v2274_v45  ;;  %v1826_v45 = vld [vmem:[%s2299_s6 + $0x10] sm:$0xff] }
 0x187   : > { %1167 = vmatpush.bf16.msra.mxu1 %v2270_v46  ;;  %1877 = vmatpush.bf16.msrb.mxu3 %v2270_v46  ;;  %v1829_v46 = vld [vmem:[%s2299_s6 + $0x28] sm:$0xff] }
 0x18a   : > { %1738 = vmatmul.msk.bf16.vlgmr.msra.gmra.mxu1 %vm1105_vm2, %v1824_v61  ;;  %1751 = vmatmul.msk.bf16.vlgmr.msrb.gmra.mxu3 %vm1105_vm2, %v1837_v60 }
 0x19a   : > { %1739 = vmatmul.msk.bf16.gmra.mxu1 %vm1105_vm2, %v1825_v4  ;;  %1752 = vmatmul.msk.bf16.gmra.mxu3 %vm1105_vm2, %v1838_v63 }
 0x1aa   : > { %1740 = vmatmul.msk.bf16.gmra.mxu1 %vm1105_vm2, %v1826_v45  ;;  %1753 = vmatmul.msk.bf16.gmra.mxu3 %vm1105_vm2, %v1839_v1 }
 0x1ba   : > { %1741 = vmatmul.msk.bf16.gmra.mxu1 %vm1105_vm2, %v1827_v58  ;;  %1754 = vmatmul.msk.bf16.gmra.mxu3 %vm1105_vm2, %v1840_v29 }
 0x1ca   : > { %1742 = vmatmul.msk.bf16.gmra.mxu1 %vm1105_vm2, %v1828_v19  ;;  %1755 = vmatmul.msk.bf16.gmra.mxu3 %vm1105_vm2, %v1841_v13 }
 0x1da   : > { %1743 = vmatmul.msk.bf16.gmra.mxu1 %vm1105_vm2, %v1829_v46 }
 0x1ea   : > { %1744 = vmatmul.msk.bf16.gmra.mxu1 %vm1105_vm2, %v1830_v62 }
 0x1fa   : > { %1745 = vmatmul.msk.bf16.gmra.mxu1 %vm1105_vm2, %v1831_v0 }
 0x207   : > { %v1169_v5 = vpop.f32.mrf.mxu1 }
 0x208   : > { %v1259_v6 = vpack.c.bf16 %v1169_v5, %v1169_v5 }
 0x20a   : > { %1296 = vst.msk [vmem:[%s2331_s9] sm:$0xf] %vm1295_vm3, %v1259_v6  ;;  %1746 = vmatmul.msk.bf16.gmra.mxu1 %vm1105_vm2, %v1832_v3 }
 0x20d   : > { %v1234_v33 = vpop.f32.mrf.mxu3 }
 0x20e   : > { %v1285_v35 = vpack.c.bf16 %v1234_v33, %v1234_v33 }
 0x20f   : > { %v1171_v7 = vpop.f32.mrf.mxu1 }
 0x210   : > { %v1260_v8 = vpack.c.bf16 %v1171_v7, %v1171_v7  ;;  %1322 = vst.msk [vmem:[%s2331_s9 + $0x68] sm:$0xf] %vm1295_vm3, %v1285_v35 }
 0x212   : > { %1297 = vst.msk [vmem:[%s2331_s9 + $0x4] sm:$0xf] %vm1295_vm3, %v1260_v8 }
 0x215   : > { %v1236_v38 = vpop.f32.mrf.mxu3 }
 0x216   : > { %v1286_v39 = vpack.c.bf16 %v1236_v38, %v1236_v38 }
 0x217   : > { %v1174_v10 = vpop.f32.mrf.mxu1 }
 0x218   : > { %v1261_v11 = vpack.c.bf16 %v1174_v10, %v1174_v10  ;;  %1323 = vst.msk [vmem:[%s2331_s9 + $0x6c] sm:$0xf] %vm1295_vm3, %v1286_v39 }
 0x21a   : > { %1298 = vst.msk [vmem:[%s2331_s9 + $0x8] sm:$0xf] %vm1295_vm3, %v1261_v11  ;;  %1747 = vmatmul.msk.bf16.gmra.mxu1 %vm1105_vm2, %v1833_v9 }
 0x21d   : > { %v1239_v40 = vpop.f32.mrf.mxu3 }
 0x21e   : > { %v1287_v43 = vpack.c.bf16 %v1239_v40, %v1239_v40 }
 0x21f   : > { %v1176_v36 = vpop.f32.mrf.mxu1 }
 0x220   : > { %v1262_v14 = vpack.c.bf16 %v1176_v36, %v1176_v36  ;;  %1324 = vst.msk [vmem:[%s2331_s9 + $0x70] sm:$0xf] %vm1295_vm3, %v1287_v43 }
 0x222   : > { %1299 = vst.msk [vmem:[%s2331_s9 + $0xc] sm:$0xf] %vm1295_vm3, %v1262_v14 }
 0x225   : > { %v1241_v47 = vpop.f32.mrf.mxu3 }
 0x226   : > { %v1288_v54 = vpack.c.bf16 %v1241_v47, %v1241_v47 }
 0x227   : > { %v1179_v16 = vpop.f32.mrf.mxu1 }
 0x228   : > { %v1263_v17 = vpack.c.bf16 %v1179_v16, %v1179_v16  ;;  %1325 = vst.msk [vmem:[%s2331_s9 + $0x74] sm:$0xf] %vm1295_vm3, %v1288_v54 }
 0x22a   : > { %1300 = vst.msk [vmem:[%s2331_s9 + $0x10] sm:$0xf] %vm1295_vm3, %v1263_v17  ;;  %1748 = vmatmul.msk.bf16.gmra.mxu1 %vm1105_vm2, %v1834_v15 }
 0x22d   : > { %v1244_v12 = vpop.f32.mrf.mxu3 }
 0x22e   : > { %v1289_v52 = vpack.c.bf16 %v1244_v12, %v1244_v12 }
 0x22f   : > { %v1181_v18 = vpop.f32.mrf.mxu1 }
 0x230   : > { %v1264_v20 = vpack.c.bf16 %v1181_v18, %v1181_v18  ;;  %1326 = vst.msk [vmem:[%s2331_s9 + $0x78] sm:$0xf] %vm1295_vm3, %v1289_v52 }
 0x232   : > { %1301 = vst.msk [vmem:[%s2331_s9 + $0x14] sm:$0xf] %vm1295_vm3, %v1264_v20 }
 0x235   : > { %v1246_v55 = vpop.f32.mrf.mxu3 }
 0x236   : > { %v1290_v57 = vpack.c.bf16 %v1246_v55, %v1246_v55 }
 0x237   : > { %v1184_v22 = vpop.f32.mrf.mxu1 }
 0x238   : > { %v1265_v23 = vpack.c.bf16 %v1184_v22, %v1184_v22  ;;  %1327 = vst.msk [vmem:[%s2331_s9 + $0x7c] sm:$0xf] %vm1295_vm3, %v1290_v57 }
 0x23a   : > { %1302 = vst.msk [vmem:[%s2331_s9 + $0x18] sm:$0xf] %vm1295_vm3, %v1265_v23  ;;  %1749 = vmatmul.msk.bf16.gmra.mxu1 %vm1105_vm2, %v1835_v21 }
 0x23d   : > { %v1249_v4 = vpop.f32.mrf.mxu3 }
 0x23e   : > { %v1291_v58 = vpack.c.bf16 %v1249_v4, %v1249_v4 }
 0x23f   : > { %v1186_v42 = vpop.f32.mrf.mxu1 }
 0x240   : > { %v1266_v24 = vpack.c.bf16 %v1186_v42, %v1186_v42  ;;  %1328 = vst.msk [vmem:[%s2331_s9 + $0x80] sm:$0xf] %vm1295_vm3, %v1291_v58 }
 0x242   : > { %1303 = vst.msk [vmem:[%s2331_s9 + $0x1c] sm:$0xf] %vm1295_vm3, %v1266_v24 }
 0x245   : > { %v1251_v46 = vpop.f32.mrf.mxu3 }
 0x246   : > { %v1292_v62 = vpack.c.bf16 %v1251_v46, %v1251_v46 }
 0x247   : > { %v1189_v26 = vpop.f32.mrf.mxu1 }
 0x248   : > { %v1267_v27 = vpack.c.bf16 %v1189_v26, %v1189_v26  ;;  %1329 = vst.msk [vmem:[%s2331_s9 + $0x84] sm:$0xf] %vm1295_vm3, %v1292_v62 }
 0x24a   : > { %1304 = vst.msk [vmem:[%s2331_s9 + $0x20] sm:$0xf] %vm1295_vm3, %v1267_v27  ;;  %1750 = vmatmul.msk.bf16.gmra.mxu1 %vm1105_vm2, %v1836_v25 }
 0x24d   : > { %v1254_v0 = vpop.f32.mrf.mxu3 }
 0x24e   : > { %v1293_v3 = vpack.c.bf16 %v1254_v0, %v1254_v0 }
 0x24f   : > { %v1191_v28 = vpop.f32.mrf.mxu1 }
 0x250   : > { %v1268_v30 = vpack.c.bf16 %v1191_v28, %v1191_v28  ;;  %1330 = vst.msk [vmem:[%s2331_s9 + $0x88] sm:$0xf] %vm1295_vm3, %v1293_v3 }
 0x252   : > { %1305 = vst.msk [vmem:[%s2331_s9 + $0x24] sm:$0xf] %vm1295_vm3, %v1268_v30 }
 0x255   : > { %v1256_v6 = vpop.f32.mrf.mxu3 }
 0x256   : > { %v1294_v7 = vpack.c.bf16 %v1256_v6, %v1256_v6 }
 0x257   : > { %v1194_v31 = vpop.f32.mrf.mxu1 }
 0x258   : > { %v1269_v59 = vpack.c.bf16 %v1194_v31, %v1194_v31  ;;  %1331 = vst.msk [vmem:[%s2331_s9 + $0x8c] sm:$0xf] %vm1295_vm3, %v1294_v7 }
 0x25a   : > { %1306 = vst.msk [vmem:[%s2331_s9 + $0x28] sm:$0xf] %vm1295_vm3, %v1269_v59 }
 0x25f   : > { %v1196_v32 = vpop.f32.mrf.mxu1 }
 0x260   : > { %v1270_v34 = vpack.c.bf16 %v1196_v32, %v1196_v32 }
 0x262   : > { %1307 = vst.msk [vmem:[%s2331_s9 + $0x2c] sm:$0xf] %vm1295_vm3, %v1270_v34 }
 0x267   : > { %v1199_v37 = vpop.f32.mrf.mxu1 }
 0x268   : > { %v1271_v48 = vpack.c.bf16 %v1199_v37, %v1199_v37 }
 0x26a   : > { %1308 = vst.msk [vmem:[%s2331_s9 + $0x30] sm:$0xf] %vm1295_vm3, %v1271_v48 }
 0x26f   : > { %v1201_v2 = vpop.f32.mrf.mxu1 }
 0x270   : > { %v1272_v41 = vpack.c.bf16 %v1201_v2, %v1201_v2 }
 0x272   : > { %1309 = vst.msk [vmem:[%s2331_s9 + $0x34] sm:$0xf] %vm1295_vm3, %v1272_v41 }
 0x277   : > { %v1204_v44 = vpop.f32.mrf.mxu1 }
 0x278   : > { %v1273_v49 = vpack.c.bf16 %v1204_v44, %v1204_v44 }
 0x27a   : > { %1310 = vst.msk [vmem:[%s2331_s9 + $0x38] sm:$0xf] %vm1295_vm3, %v1273_v49 }
 0x27f   : > { %v1206_v50 = vpop.f32.mrf.mxu1 }
 0x280   : > { %v1274_v51 = vpack.c.bf16 %v1206_v50, %v1206_v50 }
 0x282   : > { %1311 = vst.msk [vmem:[%s2331_s9 + $0x3c] sm:$0xf] %vm1295_vm3, %v1274_v51 }
 0x287   : > { %v1209_v53 = vpop.f32.mrf.mxu1 }
 0x288   : > { %v1275_v56 = vpack.c.bf16 %v1209_v53, %v1209_v53 }
 0x28a   : > { %1312 = vst.msk [vmem:[%s2331_s9 + $0x40] sm:$0xf] %vm1295_vm3, %v1275_v56 }
 0x28f   : > { %v1211_v61 = vpop.f32.mrf.mxu1 }
 0x290   : > { %v1276_v45 = vpack.c.bf16 %v1211_v61, %v1211_v61 }
 0x292   : > { %1313 = vst.msk [vmem:[%s2331_s9 + $0x44] sm:$0xf] %vm1295_vm3, %v1276_v45 }
 0x297   : > { %v1214_v19 = vpop.f32.mrf.mxu1 }
 0x298   : > { %v1277_v60 = vpack.c.bf16 %v1214_v19, %v1214_v19 }
 0x29a   : > { %1314 = vst.msk [vmem:[%s2331_s9 + $0x48] sm:$0xf] %vm1295_vm3, %v1277_v60 }
 0x29f   : > { %v1216_v63 = vpop.f32.mrf.mxu1 }
 0x2a0   : > { %v1278_v1 = vpack.c.bf16 %v1216_v63, %v1216_v63 }
 0x2a2   : > { %1315 = vst.msk [vmem:[%s2331_s9 + $0x4c] sm:$0xf] %vm1295_vm3, %v1278_v1 }
 0x2a7   : > { %v1219_v5 = vpop.f32.mrf.mxu1 }
 0x2a8   : > { %v1279_v29 = vpack.c.bf16 %v1219_v5, %v1219_v5 }
 0x2aa   : > { %1316 = vst.msk [vmem:[%s2331_s9 + $0x50] sm:$0xf] %vm1295_vm3, %v1279_v29 }
 0x2af   : > { %v1221_v8 = vpop.f32.mrf.mxu1 }
 0x2b0   : > { %v1280_v9 = vpack.c.bf16 %v1221_v8, %v1221_v8 }
 0x2b2   : > { %1317 = vst.msk [vmem:[%s2331_s9 + $0x54] sm:$0xf] %vm1295_vm3, %v1280_v9 }
 0x2b7   : > { %v1224_v10 = vpop.f32.mrf.mxu1 }
 0x2b8   : > { %v1281_v11 = vpack.c.bf16 %v1224_v10, %v1224_v10 }
 0x2ba   : > { %1318 = vst.msk [vmem:[%s2331_s9 + $0x58] sm:$0xf] %vm1295_vm3, %v1281_v11 }
 0x2bf   : > { %v1226_v13 = vpop.f32.mrf.mxu1 }
 0x2c0   : > { %v1282_v36 = vpack.c.bf16 %v1226_v13, %v1226_v13 }
 0x2c2   : > { %1319 = vst.msk [vmem:[%s2331_s9 + $0x5c] sm:$0xf] %vm1295_vm3, %v1282_v36 }
 0x2c7   : > { %v1229_v14 = vpop.f32.mrf.mxu1 }
 0x2c8   : > { %v1283_v15 = vpack.c.bf16 %v1229_v14, %v1229_v14 }
 0x2ca   : > { %1320 = vst.msk [vmem:[%s2331_s9 + $0x60] sm:$0xf] %vm1295_vm3, %v1283_v15 }
 0x2cf   : > { %v1231_v16 = vpop.f32.mrf.mxu1 }
 0x2d0   : > { %v1284_v17 = vpack.c.bf16 %v1231_v16, %v1231_v16 }
 0x2d2   : > { %1321 = vst.msk [vmem:[%s2331_s9 + $0x64] sm:$0xf] %vm1295_vm3, %v1284_v17 }
 0x2d3 PF: > { %s14_s15 = sadd.s32 1, %s1894_s15  }
 0x2d4   : > { %p11_p4 = scmp.ge.s32.totalorder %s14_s15, 4  }
 0x2d6   :  { %13 = sbr.rel (!%p11_p4) target bundleno = 1 (0x1), region = 66 }

</bundles_post_ra>
